<compile_context>
chip_gen: v6e
topology: v6e:2x2x1
jax: 0.10.0
libtpu: 0.0.40
codegen_flags: <defaults>
</compile_context>

<pallas_src>
import jax
import jax.numpy as jnp
from jax.experimental import pallas as pl
from jax.experimental.pallas import tpu as pltpu


def _round_up(x, m):
    return ((x + m - 1) // m) * m


def mlp_kernel(x_ref, w1_ref, b1_ref, w2_ref, b2_ref, o_ref):
    # Cast the activation tile to the weight/compute dtype *inside* the kernel
    # (VPU cast, hides under MXU/DMA) instead of a wrapper-side HBM pass.
    x = x_ref[...].astype(w1_ref.dtype)
    # fc1: [TB, IN] @ [IN, H] with f32 accumulation on the MXU.
    h = jnp.dot(x, w1_ref[...], preferred_element_type=jnp.float32)
    # bias + ReLU on the VPU (free filler under the MXU / DMA).
    h = jnp.maximum(h + b1_ref[...], 0.0)
    # fc2: [TB, H] @ [H, C] with f32 accumulation.
    out = jnp.dot(h.astype(w2_ref.dtype), w2_ref[...],
                  preferred_element_type=jnp.float32)
    o_ref[...] = (out + b2_ref[...]).astype(o_ref.dtype)


def _maybe_buffered_spec(block_shape, index_map, depth):
    """BlockSpec with deeper pipelining when this JAX exposes pipeline_mode."""
    if depth <= 2:
        return pl.BlockSpec(block_shape, index_map)
    try:
        return pl.BlockSpec(block_shape, index_map,
                            pipeline_mode=pl.Buffered(depth))
    except (TypeError, AttributeError):
        return pl.BlockSpec(block_shape, index_map)


def simple_nn_forward(x, w1, b1, w2, b2, *, tile_b=1024, compute_dtype=None):
    """Fused MLP forward: relu(x @ w1 + b1) @ w2 + b2.

    x : [B, IN] f32
    w1: [IN, H] f32, b1: [1, H] f32
    w2: [H, C]  f32, b2: [1, C] f32
    compute_dtype: None -> f32 matmuls; jnp.bfloat16 -> bf16 weights and an
        in-kernel bf16 cast of the x tile, with f32 MXU accumulation
        (valid on v5e / v6e / v7x).
    Returns [B, C] f32.
    """
    B, IN = x.shape
    H = w1.shape[1]
    C = w2.shape[1]

    # Only the tiny resident weights are cast in the wrapper; x stays as-is in
    # HBM and is cast per-tile inside the kernel.
    if compute_dtype is not None:
        w1 = w1.astype(compute_dtype)
        w2 = w2.astype(compute_dtype)
    w_itemsize = jnp.dtype(w1.dtype).itemsize
    x_itemsize = jnp.dtype(x.dtype).itemsize

    # Sublane multiple for the compute dtype: 8 (f32), 16 (bf16), 32 (int8/fp8).
    sublane = max(8, 32 // w_itemsize)

    # ---- batch tiling -------------------------------------------------------
    # Big tiles amortize the ~0.35 us per-grid-step overhead; rows are balanced
    # across steps so padding is at most one sublane-round per step.  No
    # jnp.pad: Pallas masks the boundary block's out-of-range rows on the
    # output write, and garbage rows can't contaminate valid rows (row-wise op).
    n_steps = max(1, pl.cdiv(B, tile_b))
    if n_steps < 2 and B >= 256:
        n_steps = 2          # let v7x's 2 TensorCores each take ~half the batch
    tile_b_eff = min(_round_up(pl.cdiv(B, n_steps), sublane),
                     _round_up(B, sublane))

    # Analytic VMEM clamp: triple-buffered x & out tiles + fc1 activations +
    # weights, kept well under every generation's scoped/physical limit.
    weight_bytes = (IN * H + H * C) * w_itemsize + (H + C) * 4
    per_row_bytes = 3 * (IN * x_itemsize + C * 4) + H * 4
    budget = 20 * 1024 * 1024
    max_tile = max(sublane,
                   ((budget - 2 * weight_bytes) // per_row_bytes)
                   // sublane * sublane)
    tile_b_eff = min(tile_b_eff, max_tile)
    n_steps = pl.cdiv(B, tile_b_eff)
    grid = (n_steps,)

    # Deeper pipelining on the streamed operands once the grid is deep enough.
    buf_depth = 3 if n_steps >= 3 else 2

    cost = pl.CostEstimate(
        flops=2 * B * (IN * H + H * C),
        transcendentals=0,
        bytes_accessed=(B * IN * x_itemsize        # x
                        + IN * H * w_itemsize      # w1
                        + H * C * w_itemsize       # w2
                        + (H + C) * 4              # biases (f32)
                        + B * C * 4),              # output (f32)
    )

    out = pl.pallas_call(
        mlp_kernel,
        out_shape=jax.ShapeDtypeStruct((B, C), jnp.float32),
        grid_spec=pltpu.PrefetchScalarGridSpec(
            num_scalar_prefetch=0,
            grid=grid,
            in_specs=[
                _maybe_buffered_spec((tile_b_eff, IN), lambda i: (i, 0),
                                     buf_depth),                # x tile (streamed)
                pl.BlockSpec((IN, H), lambda i: (0, 0)),        # w1 (resident)
                pl.BlockSpec((1, H), lambda i: (0, 0)),         # b1
                pl.BlockSpec((H, C), lambda i: (0, 0)),         # w2 (resident)
                pl.BlockSpec((1, C), lambda i: (0, 0)),         # b2
            ],
            out_specs=_maybe_buffered_spec((tile_b_eff, C), lambda i: (i, 0),
                                           buf_depth),
        ),
        compiler_params=pltpu.CompilerParams(
            # Batch axis is embarrassingly parallel -> shards across the two
            # TensorCores on v7x whenever n_steps >= 2; no-op on v5e/v6e.
            dimension_semantics=("parallel",),
            # Explicit scoped-VMEM budget: raises v5e's 16 MiB default while
            # staying inside v7x's 64 MiB physical VMEM.
            vmem_limit_bytes=32 * 1024 * 1024,
        ),
        cost_estimate=cost,
    )(x, w1, b1, w2, b2)
    return out


def init_params(key, input_size, num_classes, hidden=128):
    # Deterministic init mimicking PyTorch nn.Linear default (U[-1/sqrt(fan_in), +]).
    k1, k2, k3, k4 = jax.random.split(key, 4)
    bound1 = 1.0 / jnp.sqrt(input_size)
    bound2 = 1.0 / jnp.sqrt(hidden)
    w1 = jax.random.uniform(k1, (input_size, hidden), jnp.float32, -bound1, bound1)
    b1 = jax.random.uniform(k2, (1, hidden), jnp.float32, -bound1, bound1)
    w2 = jax.random.uniform(k3, (hidden, num_classes), jnp.float32, -bound2, bound2)
    b2 = jax.random.uniform(k4, (1, num_classes), jnp.float32, -bound2, bound2)
    return w1, b1, w2, b2


if __name__ == "__main__":
    INPUT_SIZE, NUM_CLASSES = 32, 16

    key = jax.random.PRNGKey(0)
    kx, kp, kx2, kx3 = jax.random.split(key, 4)
    w1, b1, w2, b2 = init_params(kp, INPUT_SIZE, NUM_CLASSES)

    def ref_fn(xv):
        return jnp.maximum(xv @ w1 + b1, 0.0) @ w2 + b2

    # 1) small f32 path (single grid step, strict check).
    B = 8
    x = jax.random.normal(kx, (B, INPUT_SIZE), jnp.float32)
    out = jax.block_until_ready(simple_nn_forward(x, w1, b1, w2, b2))
    assert out.shape == (B, NUM_CLASSES)
    assert jnp.allclose(out, ref_fn(x), atol=1e-5, rtol=1e-5)

    # 2) non-sublane batch + bf16 compute (boundary-block masking, 16-row sublane).
    B2 = 37
    x2 = jax.random.normal(kx2, (B2, INPUT_SIZE), jnp.float32)
    out2 = jax.block_until_ready(
        simple_nn_forward(x2, w1, b1, w2, b2, compute_dtype=jnp.bfloat16))
    assert out2.shape == (B2, NUM_CLASSES)
    assert jnp.allclose(out2, ref_fn(x2), atol=2e-2, rtol=2e-2)  # bf16 tolerance

    # 3) multi-step grid (>=3 steps -> Buffered(3)) with a ragged batch tail.
    B3 = 1300
    x3 = jax.random.normal(kx3, (B3, INPUT_SIZE), jnp.float32)
    out3 = jax.block_until_ready(
        simple_nn_forward(x3, w1, b1, w2, b2, tile_b=512))
    assert out3.shape == (B3, NUM_CLASSES)
    assert jnp.allclose(out3, ref_fn(x3), atol=1e-4, rtol=1e-4)

    print("KERNEL_OK")
</pallas_src>

<mosaic_0001>
module attributes {stable_mosaic.version = 11 : i64} {
  func.func @mlp_kernel(%arg0: i32, %arg1: memref<8x32xf32, #tpu.memory_space<vmem>>, %arg2: memref<32x128xf32, #tpu.memory_space<vmem>>, %arg3: memref<1x128xf32, #tpu.memory_space<vmem>>, %arg4: memref<128x16xf32, #tpu.memory_space<vmem>>, %arg5: memref<1x16xf32, #tpu.memory_space<vmem>>, %arg6: memref<8x16xf32, #tpu.memory_space<vmem>>) attributes {dimension_semantics = [#tpu.dimension_semantics<parallel>], iteration_bounds = array<i64: 1>, scalar_prefetch = 0 : i64, scratch_operands = 0 : i64, tpu.core_type = #tpu.core_type<tc>, window_params = [{transform_indices = @transform_0, window_bounds = array<i64: 8, 32>}, {pipeline_mode = #tpu.pipeline_mode<synchronous>, transform_indices = @transform_1, window_bounds = array<i64: 32, 128>}, {pipeline_mode = #tpu.pipeline_mode<synchronous>, transform_indices = @transform_2, window_bounds = array<i64: 1, 128>}, {pipeline_mode = #tpu.pipeline_mode<synchronous>, transform_indices = @transform_3, window_bounds = array<i64: 128, 16>}, {pipeline_mode = #tpu.pipeline_mode<synchronous>, transform_indices = @transform_4, window_bounds = array<i64: 1, 16>}, {transform_indices = @transform_5, window_bounds = array<i64: 8, 16>}]} {
    %c0 = arith.constant 0 : index
    %c0_0 = arith.constant 0 : index
    %0 = vector.load %arg1[%c0, %c0_0] : memref<8x32xf32, #tpu.memory_space<vmem>>, vector<8x32xf32>
    %c0_1 = arith.constant 0 : index
    %c0_2 = arith.constant 0 : index
    %1 = vector.load %arg2[%c0_1, %c0_2] : memref<32x128xf32, #tpu.memory_space<vmem>>, vector<32x128xf32>
    %cst = arith.constant dense<0.000000e+00> : vector<8x128xf32>
    %2 = tpu.matmul %0, %1, %cst {dimension_numbers = #tpu.dot_dimension_numbers<[1], [0], [0], [1], [0, 0, 1, 1], [], []>} : vector<8x32xf32>, vector<32x128xf32>, vector<8x128xf32> -> vector<8x128xf32>
    %c0_3 = arith.constant 0 : index
    %c0_4 = arith.constant 0 : index
    %3 = vector.load %arg3[%c0_3, %c0_4] : memref<1x128xf32, #tpu.memory_space<vmem>>, vector<1x128xf32>
    %4 = vector.broadcast %3 : vector<1x128xf32> to vector<8x128xf32>
    %5 = arith.addf %2, %4 : vector<8x128xf32>
    %cst_5 = arith.constant 0.000000e+00 : f32
    %6 = vector.broadcast %cst_5 : f32 to vector<8x128xf32>
    %7 = arith.maximumf %5, %6 : vector<8x128xf32>
    %c0_6 = arith.constant 0 : index
    %c0_7 = arith.constant 0 : index
    %8 = vector.load %arg4[%c0_6, %c0_7] : memref<128x16xf32, #tpu.memory_space<vmem>>, vector<128x16xf32>
    %cst_8 = arith.constant dense<0.000000e+00> : vector<8x16xf32>
    %9 = tpu.matmul %7, %8, %cst_8 {dimension_numbers = #tpu.dot_dimension_numbers<[1], [0], [0], [1], [0, 0, 1, 1], [], []>} : vector<8x128xf32>, vector<128x16xf32>, vector<8x16xf32> -> vector<8x16xf32>
    %c0_9 = arith.constant 0 : index
    %c0_10 = arith.constant 0 : index
    %10 = vector.load %arg5[%c0_9, %c0_10] : memref<1x16xf32, #tpu.memory_space<vmem>>, vector<1x16xf32>
    %11 = vector.broadcast %10 : vector<1x16xf32> to vector<8x16xf32>
    %12 = arith.addf %9, %11 : vector<8x16xf32>
    %c0_11 = arith.constant 0 : index
    %c0_12 = arith.constant 0 : index
    %13 = vector.load %arg6[%c0_11, %c0_12] : memref<8x16xf32, #tpu.memory_space<vmem>>, vector<8x16xf32>
    tpu.vector_store %arg6[%c0_11, %c0_12], %12 {strides = array<i32>} : memref<8x16xf32, #tpu.memory_space<vmem>>, vector<8x16xf32>,
    return
  }
  func.func @transform_0(%arg0: i32) -> (i32, i32) {
    %c0_i32 = arith.constant 0 : i32
    %c0_i32_0 = arith.constant 0 : i32
    return %arg0, %c0_i32 : i32, i32
  }
  func.func @transform_1(%arg0: i32) -> (i32, i32) {
    %c0_i32 = arith.constant 0 : i32
    %c0_i32_0 = arith.constant 0 : i32
    %c0_i32_1 = arith.constant 0 : i32
    return %c0_i32, %c0_i32_0 : i32, i32
  }
  func.func @transform_2(%arg0: i32) -> (i32, i32) {
    %c0_i32 = arith.constant 0 : i32
    %c0_i32_0 = arith.constant 0 : i32
    %c0_i32_1 = arith.constant 0 : i32
    return %c0_i32, %c0_i32_0 : i32, i32
  }
  func.func @transform_3(%arg0: i32) -> (i32, i32) {
    %c0_i32 = arith.constant 0 : i32
    %c0_i32_0 = arith.constant 0 : i32
    %c0_i32_1 = arith.constant 0 : i32
    return %c0_i32, %c0_i32_0 : i32, i32
  }
  func.func @transform_4(%arg0: i32) -> (i32, i32) {
    %c0_i32 = arith.constant 0 : i32
    %c0_i32_0 = arith.constant 0 : i32
    %c0_i32_1 = arith.constant 0 : i32
    return %c0_i32, %c0_i32_0 : i32, i32
  }
  func.func @transform_5(%arg0: i32) -> (i32, i32) {
    %c0_i32 = arith.constant 0 : i32
    %c0_i32_0 = arith.constant 0 : i32
    return %arg0, %c0_i32 : i32, i32
  }
}

</mosaic_0001>

<bundles_post_ra>
// kernel: tpu_custom_call.1
= control target key start
LH: loop header
LB: loop body
LE: loop exit
PB: predicated region body
PF: predicated region fallthrough
CT: control target
= control target key end

     0   :  { %v313_v1 = vmov 0.0   ;;  %vm314_vm0 = vmmov 0   ;;  %vm33_vm1 = vcmask 261120   ;;  %s442_s0 = inlined_call_operand.vmem [shape: f32[8,32], index: 0, kind: input, shape index: {}]   ;;  %s443_s1 = inlined_call_operand.vmem [shape: f32[32,128], index: 1, kind: input, shape index: {}]   ;;  %s444_s2 = inlined_call_operand.vmem [shape: f32[1,128], index: 2, kind: input, shape index: {}]   ;;  %s445_s3 = inlined_call_operand.vmem [shape: f32[128,16], index: 3, kind: input, shape index: {}]   ;;  %s446_s4 = inlined_call_operand.vmem [shape: f32[1,16], index: 4, kind: input, shape index: {}]   ;;  %s447_s5 = inlined_call_operand.hbm [shape: f32[8,16], index: 5, kind: output, shape index: {}]  }
   0x1   :  { %v25_v0 = vld [vmem:[%s443_s1 + $0x18] sm:$0xff]  ;;  %242 = vmatprep.subr.mxu0 %v313_v1  ;;  %v24_v2 = vld [vmem:[%s443_s1 + $0x10] sm:$0xff]  ;;  %250 = vmatprep.mubr.msk.f32.mxu0 %vm314_vm0, %v313_v1  ;;  %v23_v5 = vld [vmem:[%s443_s1 + $0x8] sm:$0xff] }
   0x2   :  { %v123_v3 = vld [vmem:[%s445_s3 + $0x78] sm:$0xff]  ;;  %243 = vmatpush3.msra.mxu0 %v25_v0  ;;  %253 = vmatprep.subr.mxu1 %v313_v1  ;;  %v122_v4 = vld [vmem:[%s445_s3 + $0x70] sm:$0xff]  ;;  %v121_v6 = vld [vmem:[%s445_s3 + $0x68] sm:$0xff] }
   0x3   :  { %244 = vmatprep.subr.mxu0 %v313_v1  ;;  %254 = vmatpush3.msra.mxu1 %v123_v3  ;;  %v22_v7 = vld [vmem:[%s443_s1] sm:$0xff] }
   0x4   :  { %245 = vmatpush3.msra.mxu0 %v24_v2  ;;  %255 = vmatprep.subr.mxu1 %v313_v1  ;;  %v21_v8 = vld [vmem:[%s442_s0] sm:$0xff] }
   0x5   :  { %246 = vmatprep.subr.mxu0 %v313_v1  ;;  %256 = vmatpush3.msra.mxu1 %v122_v4  ;;  %v120_v9 = vld [vmem:[%s445_s3 + $0x60] sm:$0xff] }
   0x6   :  { %247 = vmatpush3.msra.mxu0 %v23_v5  ;;  %257 = vmatprep.subr.mxu1 %v313_v1 }
   0x7   :  { %10 = vsyncpa [#allocation3], 0  ;;  %248 = vmatprep.subr.mxu0 %v313_v1  ;;  %258 = vmatpush3.msra.mxu1 %v121_v6  ;;  %v119_v10 = vld [vmem:[%s445_s3 + $0x58] sm:$0xff]  ;;  %v118_v11 = vld [vmem:[%s445_s3 + $0x50] sm:$0xff]  ;;  %s315_s11 = smov [#allocation2]   ;;  %vm201_vm2 = vcmask 130048  }
   0x8   :  { %249 = vmatpush3.msra.mxu0 %v22_v7  ;;  %259 = vmatprep.subr.mxu1 %v313_v1  ;;  %v117_v12 = vld [vmem:[%s445_s3 + $0x48] sm:$0xff]  ;;  %v116_v13 = vld [vmem:[%s445_s3 + $0x40] sm:$0xff]  ;;  %v115_v14 = vld [vmem:[%s445_s3 + $0x38] sm:$0xff]  ;;  %s209_s0 = sshll.u32 %s315_s11, 4  ;;  %s210_s0 = int_to_ptr.vmem [resolvable:$true] %s209_s0 }
   0x9   :  { %251 = vmatmul.mubr.msk.f32.vlgmr.msra.gmra.mxu0 %vm33_vm1, %v21_v8  ;;  %260 = vmatpush3.msra.mxu1 %v120_v9  ;;  %v114_v15 = vld [vmem:[%s445_s3 + $0x30] sm:$0xff]  ;;  %v113_v16 = vld [vmem:[%s445_s3 + $0x28] sm:$0xff]  ;;  %v112_v17 = vld [vmem:[%s445_s3 + $0x20] sm:$0xff]  ;;  %p296_p1 = scmp.lt.s32.totalorder %s210_s0, %s210_s0 }
   0xa   :  { %261 = vmatprep.subr.mxu1 %v313_v1  ;;  %285 = vmatprep.mubr.msk.f32.mxu1 %vm314_vm0, %v313_v1  ;;  %v111_v18 = vld [vmem:[%s445_s3 + $0x18] sm:$0xff]  ;;  %v110_v19 = vld [vmem:[%s445_s3 + $0x10] sm:$0xff]  ;;  %v109_v20 = vld [vmem:[%s445_s3 + $0x8] sm:$0xff] }
   0xb   :  { %262 = vmatpush3.msra.mxu1 %v119_v10  ;;  %v108_v21 = vld [vmem:[%s445_s3] sm:$0xff]  ;;  %s291_s3 = scalar_lea.vmem %s210_s0, 128 }
   0xc   :  { %263 = vmatprep.subr.mxu1 %v313_v1  ;;  %v217_v22 = vld [vmem:[%s444_s2] ss:$0 sm:$0xff]  ;;  %p292_p0 = scmp.ne.s32.totalorder %s210_s0, %s291_s3  ;;  %p297_p2 = scmp.lt.s32.totalorder %s291_s3, %s291_s3 }
   0xd   :  { %264 = vmatpush3.msra.mxu1 %v118_v11  ;;  %v219_v27 = vld [vmem:[%s446_s4] ss:$0 sm:$0xff] }
   0xe   :  { %265 = vmatprep.subr.mxu1 %v313_v1  ;;  %p298_p3 = por %p297_p2, %p296_p1 }
   0xf   :  { %266 = vmatpush3.msra.mxu1 %v117_v12 }
  0x10   :  { %267 = vmatprep.subr.mxu1 %v313_v1  ;;  %p299_p4 = pnand %p298_p3, %p292_p0 }
  0x11   :  { %268 = vmatpush3.msra.mxu1 %v116_v13 }
  0x12   :  { %269 = vmatprep.subr.mxu1 %v313_v1 }
  0x13   :  { %270 = vmatpush3.msra.mxu1 %v115_v14 }
  0x14   :  { %271 = vmatprep.subr.mxu1 %v313_v1 }
  0x15   :  { %272 = vmatpush3.msra.mxu1 %v114_v15 }
  0x16   :  { %273 = vmatprep.subr.mxu1 %v313_v1 }
  0x17   :  { %274 = vmatpush3.msra.mxu1 %v113_v16 }
  0x18   :  { %275 = vmatprep.subr.mxu1 %v313_v1 }
  0x19   :  { %276 = vmatpush3.msra.mxu1 %v112_v17 }
  0x1a   :  { %277 = vmatprep.subr.mxu1 %v313_v1 }
  0x1b   :  { %278 = vmatpush3.msra.mxu1 %v111_v18 }
  0x1c   :  { %279 = vmatprep.subr.mxu1 %v313_v1 }
  0x1d   :  { %280 = vmatpush3.msra.mxu1 %v110_v19 }
  0x1e   :  { %281 = vmatprep.subr.mxu1 %v313_v1 }
  0x1f   :  { %282 = vmatpush3.msra.mxu1 %v109_v20 }
  0x20   :  { %283 = vmatprep.subr.mxu1 %v313_v1 }
  0x21   :  { %284 = vmatpush3.msra.mxu1 %v108_v21 }
  0xc9   :  { %v103_v23 = vpop.f32.mrf.mxu0 }
  0xca   :  { %v104_v24 = vadd.f32 %v217_v22, %v103_v23 }
  0xcb   :  { %v252_v25 = vpop.f32.mrf.mxu0 }
  0xcc   :  { %v107_v26 = vmax.f32 %v104_v24, 0.0 }
  0xce   :  { %286 = vmatmul.mubr.f32.vlgmr.msra.gmra.mxu1 %v107_v26 }
 0x18e   :  { %v197_v28 = vpop.f32.mrf.mxu1 }
 0x18f   :  { %v198_v29 = vadd.f32 %v219_v27, %v197_v28 }
 0x190   :  { %v287_v30 = vpop.f32.mrf.mxu1 }
 0x191   :  { %202 = vst.msk [vmem:[#allocation2] sm:$0xff] %vm201_vm2, %v198_v29 }
 0x192   :  { %302 = shalt.err (!%p299_p4)
}
 0x193   :  { %212 = dma.vmem_to_hbm [thread:$0]  %s210_s0, 128, %s447_s5, [#allocation3]  }
 0x194   :  { %311 = dma.done.wait [#allocation3], 128  }
 0x195   :  { %312 = vsyncadd [#allocation3], 4294967168 }
 0x196   :  { %216 = vsyncpa [#allocation3], 1 }

</bundles_post_ra>
